<compile_context>
chip_gen: v7x
topology: tpu7x:2x2x1
jax: 0.10.0
libtpu: 0.0.40
codegen_flags: <defaults>
</compile_context>

<pallas_src>
import functools

import jax
import jax.numpy as jnp
from jax.experimental import pallas as pl
from jax.experimental.pallas import tpu as pltpu

_VMEM_LIMIT_BYTES = 48 * 1024 * 1024   # v7x-safe budget (64 MiB physical VMEM)
_X_BLOCK_TARGET_BYTES = 1 << 20        # ~1 MiB x-blocks reach HBM roofline
_TILE_TARGET_BYTES = 2 << 20           # per-tile target for the tiled path


def _round_up(x, m):
    return (x + m - 1) // m * m


def _choose_batch_tile(n, cp, hwp, itemsize):
    """Pack Bt samples per grid step when the per-sample slab is tiny so each
    grid step moves ~1 MiB; keep >=2 grid steps for v7x's two TensorCores and
    keep the block-diagonal weight small."""
    per_sample = cp * hwp * itemsize
    bt = 1
    for cand in range(2, n + 1):
        if n % cand:
            continue
        if cand * cp > 512:                        # block-diag weight stays small
            break
        if cand * per_sample > _X_BLOCK_TARGET_BYTES:
            break
        if n // cand < 2:                          # keep >=2 parallel grid steps
            break
        bt = cand
    return bt


# ---------------------------------------------------------------------------
# Kernels
# ---------------------------------------------------------------------------
def _cam_fused_kernel(x_ref, w1_ref, b1_ref, w2_ref, b2_ref, o_ref, *, inv_hw):
    # x_ref: (Bt*Cp, HWp) -- Bt samples stacked along the sublane axis.
    # w refs: block-diagonal (Bt*Cp, Bt*Cp); b refs: (Bt*Cp, 1).
    x = x_ref[...].astype(jnp.float32)
    pooled = jnp.sum(x, axis=-1, keepdims=True) * inv_hw            # (BD, 1)
    y1 = jnp.dot(w1_ref[...], pooled,
                 preferred_element_type=jnp.float32) + b1_ref[...]
    y1 = jnp.maximum(y1, 0.0)
    y2 = jnp.dot(w2_ref[...], y1,
                 preferred_element_type=jnp.float32) + b2_ref[...]
    att = jax.nn.sigmoid(y2)                                        # (BD, 1)
    o_ref[...] = (x * att).astype(o_ref.dtype)                      # lane bcast


def _cam_pool_att_kernel(x_ref, w1_ref, b1_ref, w2_ref, b2_ref, att_ref,
                         sum_ref, *, inv_hw):
    # grid = (N, T); T (spatial tiles) is the innermost, 'arbitrary' axis.
    t = pl.program_id(1)

    @pl.when(t == 0)
    def _():
        sum_ref[...] = jnp.zeros_like(sum_ref)

    x = x_ref[0].astype(jnp.float32)                                # (Cp, tile)
    sum_ref[...] += jnp.sum(x, axis=-1, keepdims=True)              # (Cp, 1)

    @pl.when(t == pl.num_programs(1) - 1)
    def _():
        pooled = sum_ref[...] * inv_hw
        y1 = jnp.dot(w1_ref[...], pooled,
                     preferred_element_type=jnp.float32) + b1_ref[...]
        y1 = jnp.maximum(y1, 0.0)
        y2 = jnp.dot(w2_ref[...], y1,
                     preferred_element_type=jnp.float32) + b2_ref[...]
        att_ref[0] = jax.nn.sigmoid(y2)                             # (Cp, 1)


def _cam_scale_kernel(x_ref, att_ref, o_ref):
    x = x_ref[...].astype(jnp.float32)                              # (1,Cp,tile)
    o_ref[...] = (x * att_ref[...]).astype(o_ref.dtype)             # (1,Cp,1) bcast


# ---------------------------------------------------------------------------
# Wrappers
# ---------------------------------------------------------------------------
def _cam_fused(x3, w1p, b1p, w2p, b2p, cp, hwp, bt, inv_hw):
    n, c, hw = x3.shape
    pad_c, pad_hw = cp - c, hwp - hw
    if pad_c or pad_hw:
        x3 = jnp.pad(x3, ((0, 0), (0, pad_c), (0, pad_hw)))
    x2d = x3.reshape(n * cp, hwp)

    bd = bt * cp
    eye = jnp.eye(bt, dtype=w1p.dtype)
    w1_bd = jnp.kron(eye, w1p)          # Bt samples -> one block-diag matmul
    w2_bd = jnp.kron(eye, w2p)
    b1_bd = jnp.tile(b1p, bt).reshape(bd, 1)
    b2_bd = jnp.tile(b2p, bt).reshape(bd, 1)

    kernel = functools.partial(_cam_fused_kernel, inv_hw=inv_hw)
    out2d = pl.pallas_call(
        kernel,
        out_shape=jax.ShapeDtypeStruct((n * cp, hwp), x2d.dtype),
        grid_spec=pltpu.PrefetchScalarGridSpec(
            num_scalar_prefetch=0,
            grid=(n // bt,),
            in_specs=[
                pl.BlockSpec((bd, hwp), lambda i: (i, 0)),   # x (Bt samples)
                pl.BlockSpec((bd, bd), lambda i: (0, 0)),    # w1 (fetched once)
                pl.BlockSpec((bd, 1), lambda i: (0, 0)),     # b1
                pl.BlockSpec((bd, bd), lambda i: (0, 0)),    # w2
                pl.BlockSpec((bd, 1), lambda i: (0, 0)),     # b2
            ],
            out_specs=pl.BlockSpec((bd, hwp), lambda i: (i, 0)),
        ),
        compiler_params=pltpu.CompilerParams(
            dimension_semantics=("parallel",),
            vmem_limit_bytes=_VMEM_LIMIT_BYTES),
    )(x2d, w1_bd, b1_bd, w2_bd, b2_bd)

    return out2d.reshape(n, cp, hwp)


def _cam_tiled(x3, w1p, b1p, w2p, b2p, cp, inv_hw, tile_hw):
    n, c, hw = x3.shape
    itemsize = jnp.dtype(x3.dtype).itemsize
    if tile_hw is None:
        tile_hw = max(128, (_TILE_TARGET_BYTES // (cp * itemsize)) // 128 * 128)
    tile_hw = _round_up(tile_hw, 128)
    tile_hw = min(tile_hw, _round_up(hw, 128))
    hwp = _round_up(hw, tile_hw)
    num_t = hwp // tile_hw

    pad_c, pad_hw = cp - c, hwp - hw
    if pad_c or pad_hw:
        x3 = jnp.pad(x3, ((0, 0), (0, pad_c), (0, pad_hw)))
    b1c = b1p.reshape(cp, 1)
    b2c = b2p.reshape(cp, 1)

    # Pass 1: channel sums over spatial tiles -> per-sample attention (N,Cp,1).
    pool_kernel = functools.partial(_cam_pool_att_kernel, inv_hw=inv_hw)
    att = pl.pallas_call(
        pool_kernel,
        out_shape=jax.ShapeDtypeStruct((n, cp, 1), jnp.float32),
        grid_spec=pltpu.PrefetchScalarGridSpec(
            num_scalar_prefetch=0,
            grid=(n, num_t),
            in_specs=[
                pl.BlockSpec((1, cp, tile_hw), lambda i, t: (i, 0, t)),
                pl.BlockSpec((cp, cp), lambda i, t: (0, 0)),
                pl.BlockSpec((cp, 1), lambda i, t: (0, 0)),
                pl.BlockSpec((cp, cp), lambda i, t: (0, 0)),
                pl.BlockSpec((cp, 1), lambda i, t: (0, 0)),
            ],
            out_specs=pl.BlockSpec((1, cp, 1), lambda i, t: (i, 0, 0)),
            scratch_shapes=[pltpu.VMEM((cp, 1), jnp.float32)],
        ),
        compiler_params=pltpu.CompilerParams(
            dimension_semantics=("parallel", "arbitrary"),
            vmem_limit_bytes=_VMEM_LIMIT_BYTES),
    )(x3, w1p, b1c, w2p, b2c)

    # Pass 2: broadcast-multiply per spatial tile.
    out3 = pl.pallas_call(
        _cam_scale_kernel,
        out_shape=jax.ShapeDtypeStruct((n, cp, hwp), x3.dtype),
        grid_spec=pltpu.PrefetchScalarGridSpec(
            num_scalar_prefetch=0,
            grid=(n, num_t),
            in_specs=[
                pl.BlockSpec((1, cp, tile_hw), lambda i, t: (i, 0, t)),
                pl.BlockSpec((1, cp, 1), lambda i, t: (i, 0, 0)),
            ],
            out_specs=pl.BlockSpec((1, cp, tile_hw), lambda i, t: (i, 0, t)),
        ),
        compiler_params=pltpu.CompilerParams(
            dimension_semantics=("parallel", "parallel"),
            vmem_limit_bytes=_VMEM_LIMIT_BYTES),
    )(x3, att)

    return out3


def cam_forward(x_nchw, w1, b1, w2, b2, *, force_tiled=False, tile_hw=None):
    """CAM forward.  x_nchw: (N, C, H, W).  w1, w2: (C, C) 1x1-conv weights
    (squeezed from (C, C, 1, 1)).  b1, b2: (C,) conv biases."""
    n, c, h, w = x_nchw.shape
    hw = h * w
    itemsize = jnp.dtype(x_nchw.dtype).itemsize
    cp = _round_up(c, 8)                 # sublane-align the channel axis

    # Zero-pad weights/biases to Cp channels; padded x channels are zero, so
    # padded channels never pollute the real attention values.
    w1p = jnp.pad(w1, ((0, cp - c), (0, cp - c))).astype(jnp.float32)
    w2p = jnp.pad(w2, ((0, cp - c), (0, cp - c))).astype(jnp.float32)
    b1p = jnp.pad(b1, (0, cp - c)).astype(jnp.float32)
    b2p = jnp.pad(b2, (0, cp - c)).astype(jnp.float32)

    x3 = x_nchw.reshape(n, c, hw)
    inv_hw = 1.0 / hw

    # Fused single pass only when the per-step working set (in + out, double
    # buffered, plus weights) fits comfortably in v7x's 64 MiB physical VMEM.
    hwp128 = _round_up(hw, 128)          # lane-align the flattened spatial axis
    bt = _choose_batch_tile(n, cp, hwp128, itemsize)
    bd = bt * cp
    block_bytes = bd * hwp128 * itemsize
    weight_bytes = 2 * bd * bd * 4 + 2 * bd * 4
    fused_vmem = 4 * block_bytes + 2 * weight_bytes + (2 << 20)
    use_fused = (not force_tiled) and fused_vmem <= _VMEM_LIMIT_BYTES

    if use_fused:
        out3 = _cam_fused(x3, w1p, b1p, w2p, b2p, cp, hwp128, bt, inv_hw)
    else:
        out3 = _cam_tiled(x3, w1p, b1p, w2p, b2p, cp, inv_hw, tile_hw)

    return out3[:, :c, :hw].reshape(n, c, h, w)


def cam_reference(x, w1, b1, w2, b2):
    """Pure-JAX reference (mirrors the PyTorch forward)."""
    pooled = jnp.mean(x, axis=(2, 3), keepdims=True)                # (N,C,1,1)
    y1 = jnp.einsum('oc,nchw->nohw', w1, pooled) + b1[None, :, None, None]
    y1 = jnp.maximum(y1, 0.0)
    y2 = jnp.einsum('oc,nchw->nohw', w2, y1) + b2[None, :, None, None]
    return x * jax.nn.sigmoid(y2)


if __name__ == "__main__":
    key = jax.random.PRNGKey(0)

    def make_case(k, n, c, h, w):
        k_x, k_w1, k_b1, k_w2, k_b2 = jax.random.split(k, 5)
        x = jax.random.normal(k_x, (n, c, h, w), dtype=jnp.float32)
        w1 = jax.random.normal(k_w1, (c, c), dtype=jnp.float32) * 0.5
        b1 = jax.random.normal(k_b1, (c,), dtype=jnp.float32) * 0.1
        w2 = jax.random.normal(k_w2, (c, c), dtype=jnp.float32) * 0.5
        b2 = jax.random.normal(k_b2, (c,), dtype=jnp.float32) * 0.1
        return x, w1, b1, w2, b2

    keys = jax.random.split(key, 3)

    # 1) primary small case (fused single-pass path)
    x, w1, b1, w2, b2 = make_case(keys[0], 2, 4, 16, 16)
    out = cam_forward(x, w1, b1, w2, b2)
    jax.block_until_ready(out)
    ref = cam_reference(x, w1, b1, w2, b2)
    assert out.shape == x.shape
    assert jnp.allclose(out, ref, atol=1e-5, rtol=1e-5), "fused path mismatch"

    # 2) same inputs through the two-pass tiled path (v7x / huge-feature-map fallback)
    out_t = cam_forward(x, w1, b1, w2, b2, force_tiled=True, tile_hw=128)
    jax.block_until_ready(out_t)
    assert jnp.allclose(out_t, ref, atol=1e-5, rtol=1e-5), "tiled path mismatch"

    # 3) non-aligned channels / spatial sizes (exercises sublane & lane padding)
    x, w1, b1, w2, b2 = make_case(keys[1], 2, 5, 7, 7)
    out = cam_forward(x, w1, b1, w2, b2)
    jax.block_until_ready(out)
    assert jnp.allclose(out, cam_reference(x, w1, b1, w2, b2),
                        atol=1e-5, rtol=1e-5), "padded case mismatch"

    # 4) many small samples (exercises multi-sample packing per grid step)
    x, w1, b1, w2, b2 = make_case(keys[2], 8, 4, 8, 8)
    out = cam_forward(x, w1, b1, w2, b2)
    jax.block_until_ready(out)
    assert jnp.allclose(out, cam_reference(x, w1, b1, w2, b2),
                        atol=1e-5, rtol=1e-5), "batched case mismatch"

    print("KERNEL_OK")
</pallas_src>

<mosaic_0001>
module attributes {stable_mosaic.version = 11 : i64} {
  func.func @_cam_fused_kernel(%arg0: i32, %arg1: memref<8x256xf32, #tpu.memory_space<vmem>>, %arg2: memref<8x8xf32, #tpu.memory_space<vmem>>, %arg3: memref<8x1xf32, #tpu.memory_space<vmem>>, %arg4: memref<8x8xf32, #tpu.memory_space<vmem>>, %arg5: memref<8x1xf32, #tpu.memory_space<vmem>>, %arg6: memref<8x256xf32, #tpu.memory_space<vmem>>) attributes {dimension_semantics = [#tpu.dimension_semantics<parallel>], iteration_bounds = array<i64: 2>, scalar_prefetch = 0 : i64, scratch_operands = 0 : i64, tpu.core_type = #tpu.core_type<tc>, window_params = [{transform_indices = @transform_0, window_bounds = array<i64: 8, 256>}, {pipeline_mode = #tpu.pipeline_mode<synchronous>, transform_indices = @transform_1, window_bounds = array<i64: 8, 8>}, {pipeline_mode = #tpu.pipeline_mode<synchronous>, transform_indices = @transform_2, window_bounds = array<i64: 8, 1>}, {pipeline_mode = #tpu.pipeline_mode<synchronous>, transform_indices = @transform_3, window_bounds = array<i64: 8, 8>}, {pipeline_mode = #tpu.pipeline_mode<synchronous>, transform_indices = @transform_4, window_bounds = array<i64: 8, 1>}, {transform_indices = @transform_5, window_bounds = array<i64: 8, 256>}]} {
    %c0 = arith.constant 0 : index
    %c0_0 = arith.constant 0 : index
    %0 = vector.load %arg1[%c0, %c0_0] : memref<8x256xf32, #tpu.memory_space<vmem>>, vector<8x256xf32>
    %cst = arith.constant dense<0.000000e+00> : vector<8xf32>
    %1 = vector.multi_reduction <add>, %0, %cst [1] : vector<8x256xf32> to vector<8xf32>
    %2 = vector.shape_cast %1 : vector<8xf32> to vector<8x1xf32>
    %cst_1 = arith.constant 3.906250e-03 : f32
    %3 = vector.broadcast %cst_1 : f32 to vector<8x1xf32>
    %4 = arith.mulf %2, %3 : vector<8x1xf32>
    %c0_2 = arith.constant 0 : index
    %c0_3 = arith.constant 0 : index
    %5 = vector.load %arg2[%c0_2, %c0_3] : memref<8x8xf32, #tpu.memory_space<vmem>>, vector<8x8xf32>
    %cst_4 = arith.constant dense<0.000000e+00> : vector<8x1xf32>
    %6 = tpu.matmul %5, %4, %cst_4 {dimension_numbers = #tpu.dot_dimension_numbers<[1], [0], [0], [1], [0, 0, 1, 1], [], []>} : vector<8x8xf32>, vector<8x1xf32>, vector<8x1xf32> -> vector<8x1xf32>
    %c0_5 = arith.constant 0 : index
    %c0_6 = arith.constant 0 : index
    %7 = vector.load %arg3[%c0_5, %c0_6] : memref<8x1xf32, #tpu.memory_space<vmem>>, vector<8x1xf32>
    %8 = arith.addf %6, %7 : vector<8x1xf32>
    %cst_7 = arith.constant 0.000000e+00 : f32
    %9 = vector.broadcast %cst_7 : f32 to vector<8x1xf32>
    %10 = arith.maximumf %8, %9 : vector<8x1xf32>
    %c0_8 = arith.constant 0 : index
    %c0_9 = arith.constant 0 : index
    %11 = vector.load %arg4[%c0_8, %c0_9] : memref<8x8xf32, #tpu.memory_space<vmem>>, vector<8x8xf32>
    %cst_10 = arith.constant dense<0.000000e+00> : vector<8x1xf32>
    %12 = tpu.matmul %11, %10, %cst_10 {dimension_numbers = #tpu.dot_dimension_numbers<[1], [0], [0], [1], [0, 0, 1, 1], [], []>} : vector<8x8xf32>, vector<8x1xf32>, vector<8x1xf32> -> vector<8x1xf32>
    %c0_11 = arith.constant 0 : index
    %c0_12 = arith.constant 0 : index
    %13 = vector.load %arg5[%c0_11, %c0_12] : memref<8x1xf32, #tpu.memory_space<vmem>>, vector<8x1xf32>
    %14 = arith.addf %12, %13 : vector<8x1xf32>
    %15 = arith.negf %14 : vector<8x1xf32>
    %16 = math.exp %15 : vector<8x1xf32>
    %cst_13 = arith.constant 1.000000e+00 : f32
    %17 = vector.broadcast %cst_13 : f32 to vector<8x1xf32>
    %18 = arith.addf %17, %16 : vector<8x1xf32>
    %19 = arith.divf %17, %18 : vector<8x1xf32>
    %20 = vector.broadcast %19 : vector<8x1xf32> to vector<8x256xf32>
    %21 = arith.mulf %0, %20 : vector<8x256xf32>
    %c0_14 = arith.constant 0 : index
    %c0_15 = arith.constant 0 : index
    %22 = vector.load %arg6[%c0_14, %c0_15] : memref<8x256xf32, #tpu.memory_space<vmem>>, vector<8x256xf32>
    tpu.vector_store %arg6[%c0_14, %c0_15], %21 {strides = array<i32>} : memref<8x256xf32, #tpu.memory_space<vmem>>, vector<8x256xf32>,
    return
  }
  func.func @transform_0(%arg0: i32) -> (i32, i32) {
    %c0_i32 = arith.constant 0 : i32
    %c0_i32_0 = arith.constant 0 : i32
    return %arg0, %c0_i32 : i32, i32
  }
  func.func @transform_1(%arg0: i32) -> (i32, i32) {
    %c0_i32 = arith.constant 0 : i32
    %c0_i32_0 = arith.constant 0 : i32
    %c0_i32_1 = arith.constant 0 : i32
    return %c0_i32, %c0_i32_0 : i32, i32
  }
  func.func @transform_2(%arg0: i32) -> (i32, i32) {
    %c0_i32 = arith.constant 0 : i32
    %c0_i32_0 = arith.constant 0 : i32
    %c0_i32_1 = arith.constant 0 : i32
    return %c0_i32, %c0_i32_0 : i32, i32
  }
  func.func @transform_3(%arg0: i32) -> (i32, i32) {
    %c0_i32 = arith.constant 0 : i32
    %c0_i32_0 = arith.constant 0 : i32
    %c0_i32_1 = arith.constant 0 : i32
    return %c0_i32, %c0_i32_0 : i32, i32
  }
  func.func @transform_4(%arg0: i32) -> (i32, i32) {
    %c0_i32 = arith.constant 0 : i32
    %c0_i32_0 = arith.constant 0 : i32
    %c0_i32_1 = arith.constant 0 : i32
    return %c0_i32, %c0_i32_0 : i32, i32
  }
  func.func @transform_5(%arg0: i32) -> (i32, i32) {
    %c0_i32 = arith.constant 0 : i32
    %c0_i32_0 = arith.constant 0 : i32
    return %arg0, %c0_i32 : i32, i32
  }
}

</mosaic_0001>

<bundles_post_ra>
// kernel: tpu_custom_call.1
= control target key start
LH: loop header
LB: loop body
LE: loop exit
PB: predicated region body
PF: predicated region fallthrough
CT: control target
= control target key end

     0   :  { %10 = vsyncpa [#allocation3], 0  ;;  %s896_s0 = inlined_call_operand.hbm [shape: f32[16,256], index: 0, kind: input, shape index: {}]   ;;  %s897_s1 = inlined_call_operand.vmem [shape: f32[8,8], index: 1, kind: input, shape index: {}]   ;;  %s898_s2 = inlined_call_operand.vmem [shape: f32[8,1], index: 2, kind: input, shape index: {}]   ;;  %s899_s3 = inlined_call_operand.vmem [shape: f32[8,8], index: 3, kind: input, shape index: {}]   ;;  %s900_s4 = inlined_call_operand.vmem [shape: f32[8,1], index: 4, kind: input, shape index: {}]   ;;  %s901_s5 = inlined_call_operand.hbm [shape: f32[16,256], index: 5, kind: output, shape index: {}]  }
   0x1   :  { %12 = vsyncpa [#allocation3 + $0x1], 0 }
   0x2   :  { %13 = vsyncpa [#allocation4], 0 }
   0x3   :  { %15 = vsyncpa [#allocation4 + $0x1], 0  ;;  %s719_s18 = smov 0   ;;  %s721_s19 = smov 0  }
   0x4   :  { %s723_s20 = smov 0   ;;  %s725_s21 = smov 0  }
   0x5 LB: > { %s740_s22 = sadd.s32 4294967295, %s682_s21   ;;  %s499_s23 = sadd.s32 4294967294, %s682_s21   ;;  %s682_s21 = sphi %s725_s21, %s916_s21   ;;  %s678_s20 = sphi %s723_s20, %s915_s20   ;;  %s674_s19 = sphi %s721_s19, %s914_s19   ;;  %s670_s18 = sphi %s719_s18, %s913_s18  }
   0x6   : > { %s744_s24 = sadd.s32 1, %s682_s21   ;;  %s28_s25 = sadd.s32 1, %s678_s20 }
   0x7   : > { %s25_s26 = ssub.s32 %s682_s21, %s744_s24  ;;  %p35_p0 = scmp.ne.s32.totalorder %s678_s20, %s674_s19 }
   0x8   : > { %p26_p1 = scmp.eq.s32.totalorder %s25_s26, 0  ;;  %p36_p2 = scmp.eq.s32.totalorder %s682_s21, 0 }
   0x9   : > { %p41_p3 = scmp.ne.s32.totalorder %s674_s19, %s670_s18  ;;  %p42_p4 = scmp.eq.s32.totalorder %s740_s22, 0 }
   0xa   : > { %s756_s27 = scalar_select %p26_p1, %s678_s20, %s28_s25  }
   0xb   : > { %p758_p5 = por %p36_p2, %p35_p0  ;;  %p762_p6 = por %p42_p4, %p41_p3 }
   0xc   : > { %p149_p7 = scmp.eq.s32.totalorder %s740_s22, 1  ;;  %p155_p8 = scmp.eq.s32.totalorder %s499_s23, 1 }
   0xd   : > { %p544_p10 = scmp.lt.s32.totalorder %s682_s21, 2  ;;  %s187_s7 = sand.u32 1, %s678_s20  }
   0xe   : > { %p769_p11 = por %p149_p7, %p35_p0  ;;  %p773_p12 = por %p155_p8, %p41_p3 }
   0xf   : > { %s516_s8 = sshll.u32 %s682_s21, 8  ;;  %s502_s9 = sshll.u32 %s187_s7, 4 }
  0x10   : > { %s905_s30 = scalar_select %p769_p11, 1, 0 }
  0x11   : > { %s906_s6 = scalar_select %p773_p12, 1, 0 }
  0x12   : > { %s782_s12 = scalar_lea.hbm %s896_s0, %s516_s8  ;;  %s191_s13 = scalar_lea.vmem [#allocation2], %s502_s9 }
  0x13   : > { %s199_s14 = sshll.u32 %s191_s13, 4  ;;  %p786_p13 = pnand %p544_p10, %p758_p5  ;;  %s790_s14 = int_to_ptr.vmem [resolvable:$true] %s199_s14 }
  0x14   : > { %s188_s16 = scalar_lea.sflag [#allocation3], %s187_s7  ;;  %s586_s17 = scalar_lea.hbm %s782_s12, 256 }
  0x15   : > { %p587_p2 = scmp.ne.s32.totalorder %s782_s12, %s586_s17  ;;  %p588_p3 = pneg %p786_p13 }
  0x16   : > { %s591_s26 = scalar_lea.hbm %s896_s0, 512  ;;  %p592_p5 = scmp.lt.u32.totalorder %s782_s12, %s896_s0 }
  0x17   : > { %p589_p4 = pnand %p588_p3, %p587_p2  ;;  %p593_p8 = scmp.lt.u32.totalorder %s591_s26, %s586_s17 }
  0x18   : > { %p595_p9 = scmp.lt.u32.totalorder %s586_s17, %s782_s12 }
  0x19   : > { %p590_p7 = pneg %p589_p4  ;;  %p594_p10 = por %p593_p8, %p592_p5 }
  0x1b   : > { %p596_p0 = por %p595_p9, %p594_p10 }
  0x1d   : > { %p597_p1 = pnand %p596_p0, %p590_p7 }
  0x1f   : > { %600 = shalt.err (!%p597_p1)
}
  0x20   : > { %s601_s7 = scalar_lea.vmem %s790_s14, 256  ;;  %s684_s9 = smov [#allocation2]  }
  0x21   : > { %p602_p2 = scmp.ne.s32.totalorder %s790_s14, %s601_s7  ;;  %s606_s10 = sshll.u32 %s684_s9, 4  ;;  %s607_s10 = int_to_ptr.vmem [resolvable:$false] %s606_s10 }
  0x22   : > { %s608_s11 = scalar_lea.vmem %s607_s10, 512  ;;  %p609_p11 = scmp.lt.s32.totalorder %s790_s14, %s607_s10 }
  0x23   : > { %p604_p4 = pnand %p602_p2, %p588_p3  ;;  %p610_p5 = scmp.lt.s32.totalorder %s608_s11, %s601_s7 }
  0x25   : > { %p605_p12 = pneg %p604_p4  ;;  %p611_p8 = por %p610_p5, %p609_p11 }
  0x27   : > { %p612_p9 = pnand %p611_p8, %p605_p12 }
  0x29   : > { %615 = shalt.err (!%p612_p9)
}
  0x2a   : > { %539 = dma.hbm_to_vmem [thread:$0]  (!%p786_p13), %s782_s12, 256, %s790_s14, %s188_s16  }
  0x2b   : > { %p908_p0 = scmp.lt.s32.totalorder %s682_s21, 3  ;;  %p909_p1 = scmp.ge.s32.totalorder %s682_s21, 1 }
  0x2d   : > { %p205_p3 = pnand %p909_p1, %p908_p0 }
  0x2e   : > { %s824_s13 = sand.u32 (!%p205_p3), 1, %s674_s19  }
  0x2f   : > { %208 = sbr.rel (%p205_p3) target bundleno = 804 (0x324), region = 40  ;;  %s506_s17 = sshll.u32 (!%p205_p3), %s824_s13, 4 }
  0x30   : > { %s211_s23 = scalar_lea.sflag (!%p205_p3), [#allocation3], %s824_s13  ;;  %s214_s15 = scalar_lea.vmem (!%p205_p3), [#allocation2], %s506_s17 }
  0x36   : > { %661 = dma.done.wait (%p762_p6), %s211_s23, 256  }
  0x37   : > { %663 = vsyncadd (%p762_p6), %s211_s23, 4294967040  ;;  %v241_v0 = vld [vmem:[%s214_s15] sm:$0xff]  ;;  %v242_v1 = vld [vmem:[%s214_s15 + $0x8] sm:$0xff]  ;;  %v685_v3 = vmov 0.0   ;;  %vm686_vm0 = vmmov 0   ;;  %vm249_vm1 = vcmask 64512  }
  0x38   : > { %v243_v2 = vadd.f32 %v242_v1, %v241_v0  ;;  %522 = vmatprep.subr.mxu0 %v685_v3  ;;  %527 = vmatprep.subr.mxu1 %v685_v3  ;;  %v247_v6 = vld [vmem:[%s897_s1] sm:$0xff]  ;;  %v687_v13 = vmov 0   ;;  %s517_s7 = sshll.u32 %s740_s22, 8  ;;  %s240_s9 = scalar_lea.vmem [#allocation5], %s506_s17 }
  0x39   : > { %524 = vmatprep.mubr.msk.f32.mxu0 %vm686_vm0, %v685_v3  ;;  %529 = vmatprep.mubr.msk.f32.mxu1 %vm686_vm0, %v685_v3  ;;  %v248_v7 = vld [vmem:[%s898_s2] sm:$0xff]  ;;  %s429_s10 = sshll.u32 %s240_s9, 4  ;;  %s852_s15 = scalar_lea.hbm %s901_s5, %s517_s7  ;;  %s854_s10 = int_to_ptr.vmem [resolvable:$true] %s429_s10 }
  0x3a   : > { %244 = vadd.xlane.f32.xlu0 %v243_v2  ;;  %v324_v12 = vld [vmem:[%s899_s3] sm:$0xff]  ;;  %s415_s12 = scalar_lea.sflag [#allocation4], %s824_s13  ;;  %s616_s22 = scalar_lea.vmem %s854_s10, 256 }
  0x3b   : > { %581 = vset.pattern.permute.xlu0 %v687_v13  ;;  %v325_v14 = vld [vmem:[%s900_s4] sm:$0xff]  ;;  %p617_p6 = scmp.ne.s32.totalorder %s854_s10, %s616_s22  ;;  %p910_p11 = scmp.ne.s32.totalorder %s905_s30, 0 }
  0x3c   : > { %s688_s17 = smov [#allocation5]  }
  0x3d   : > { %p618_p12 = pnand %p617_p6, %p910_p11  ;;  %s620_s14 = sshll.u32 %s688_s17, 4  ;;  %s621_s14 = int_to_ptr.vmem [resolvable:$false] %s620_s14 }
  0x3e   : > { %s622_s29 = scalar_lea.vmem %s621_s14, 512  ;;  %p623_p7 = scmp.lt.s32.totalorder %s854_s10, %s621_s14 }
  0x3f   : > { %p619_p13 = pneg %p618_p12  ;;  %p624_p10 = scmp.lt.s32.totalorder %s622_s29, %s616_s22 }
  0x41   : > { %p625_p2 = por %p624_p10, %p623_p7 }
  0x43   : > { %p626_p4 = pnand %p625_p2, %p619_p13 }
  0xc7   : > { %v245_v4 = vpop.xlane.xlu0 %244 }
  0xc8   : > { %v246_v5 = vmul.f32 0.00390625, %v245_v4 }
  0xca   : > { %523 = vmatpush3.msra.mxu0 %v246_v5 }
  0xcb   : > { %525 = vmatmul.mubr.msk.f32.vlgmr.msra.gmra.mrb[0].mxu0 %vm249_vm1, %v247_v6 }
 0x19e   : > { %v319_v8 = vpop.f32.mrb[0].mxu0 }
 0x19f   : > { %v320_v9 = vadd.f32 %v319_v8, %v248_v7  ;;  %v526_v10 = vpop.f32.mrb[1].mxu0 }
 0x1a1   : > { %v323_v11 = vmax.f32 %v320_v9, 0.0 }
 0x1a3   : > { %528 = vmatpush3.msra.mxu1 %v323_v11 }
 0x1a4   : > { %530 = vmatmul.mubr.msk.f32.vlgmr.msra.gmra.mrb[0].mxu1 %vm249_vm1, %v324_v12 }
 0x277   : > { %v395_v15 = vpop.f32.mrb[0].mxu1 }
 0x278   : > { %v396_v16 = vadd.f32 %v395_v15, %v325_v14  ;;  %v531_v17 = vpop.f32.mrb[1].mxu1 }
 0x27a   : > { %v510_v18 = vmul.f32 -1.442695, %v396_v16 }
 0x27c   : > { %582 = vpow2.f32 %v510_v18 }
 0x286   : > { %v583_v19 = vpop.eup %582 }
 0x287   : > { %v402_v20 = vadd.f32 1.0, %v583_v19 }
 0x289   : > { %584 = vrcp.f32 %v402_v20 }
 0x293   : > { %v585_v21 = vpop.eup %584 }
 0x294   : > { %407 = vperm.xlu0 %581, %v585_v21  }
 0x313   : > { %v408_v22 = vpop.permute.xlu0 %407 }
 0x314   : > { %v410_v23 = vmul.f32 %v408_v22, %v241_v0  ;;  %v411_v24 = vmul.f32 %v408_v22, %v242_v1 }
 0x316   : > { %412 = vst [vmem:[%s240_s9] sm:$0xff] %v410_v23  ;;  %413 = vst [vmem:[%s240_s9 + $0x8] sm:$0xff] %v411_v24 }
 0x317   : > { %629 = shalt.err (!%p626_p4)
}
 0x318   : > { %s630_s13 = scalar_lea.hbm %s852_s15, 256  ;;  %s634_s26 = scalar_lea.hbm %s901_s5, 512 }
 0x319   : > { %p631_p5 = scmp.ne.s32.totalorder %s852_s15, %s630_s13  ;;  %p635_p0 = scmp.lt.u32.totalorder %s852_s15, %s901_s5 }
 0x31a   : > { %p636_p1 = scmp.lt.u32.totalorder %s634_s26, %s630_s13  ;;  %p638_p6 = scmp.lt.u32.totalorder %s630_s13, %s852_s15 }
 0x31b   : > { %p632_p8 = pnand %p631_p5, %p910_p11 }
 0x31c   : > { %p637_p3 = por %p636_p1, %p635_p0 }
 0x31d   : > { %p633_p9 = pneg %p632_p8 }
 0x31e   : > { %p639_p12 = por %p638_p6, %p637_p3 }
 0x320   : > { %p640_p13 = pnand %p639_p12, %p633_p9 }
 0x322   : > { %643 = shalt.err (!%p640_p13)
}
 0x323   : > { %534 = dma.vmem_to_hbm [thread:$0]  (%p910_p11), %s854_s10, 256, %s852_s15, %s415_s12  }
 0x324 PF: > { %s441_s7 = sand.u32 1, %s670_s18   ;;  %p911_p7 = scmp.ne.s32.totalorder %s906_s6, 0 }
 0x325   : > { %p912_p10 = scmp.ge.s32.totalorder %s682_s21, 2  ;;  %s442_s9 = scalar_lea.sflag [#allocation4], %s441_s7 }
 0x327   : > { %p541_p2 = pnand %p912_p10, %p911_p7 }
 0x329   : > { %665 = dma.done.wait (!%p541_p2), %s442_s9, 256  }
 0x32a   : > { %667 = vsyncadd (!%p541_p2), %s442_s9, 4294967040  ;;  %p18_p4 = scmp.ge.s32.totalorder %s744_s24, 4   ;;  %s913_s18 = smov %s674_s19 }
 0x32b   : > { %s914_s19 = smov %s678_s20  ;;  %s915_s20 = smov %s756_s27 }
 0x32c   : > { %s916_s21 = smov %s744_s24  ;;  %20 = sbr.rel (!%p18_p4) target bundleno = 5 (0x5), region = 85 }
 0x333   :  { %447 = vsyncpa [#allocation3], 1 }
 0x334   :  { %449 = vsyncpa [#allocation3 + $0x1], 1 }
 0x335   :  { %450 = vsyncpa [#allocation4], 1 }
 0x336   :  { %452 = vsyncpa [#allocation4 + $0x1], 1 }

</bundles_post_ra>
